<compile_context>
chip_gen: v6e
topology: v6e:2x2x1
jax: 0.10.0
libtpu: 0.0.40
codegen_flags: <defaults>
</compile_context>

<pallas_src>
import functools

import jax
import jax.numpy as jnp
from jax.experimental import pallas as pl
from jax.experimental.pallas import tpu as pltpu

EPS = 1e-07
_ACC_ROWS = 8  # one sublane group; accumulator shape is (8, C)


def _focal_loss_kernel(out_ref, tgt_ref, w_ref, loss_ref, acc_ref,
                       *, gamma, n_valid, inv_count):
    i = pl.program_id(0)
    tn = out_ref.shape[0]

    @pl.when(i == 0)
    def _init():
        acc_ref[...] = jnp.zeros_like(acc_ref)

    x = out_ref[...].astype(jnp.float32)      # logits  [TN, C]
    y = tgt_ref[...].astype(jnp.float32)      # targets [TN, C]

    p = jax.nn.sigmoid(x)
    one_m_p = 1.0 - p

    # (1-p)**gamma / p**gamma without jnp.power for integer gamma: keeps the
    # modulation on the VPU instead of burning the single EUP slot on log+exp.
    if float(gamma) == 2.0:
        pow_1mp = one_m_p * one_m_p
        pow_p = p * p
    elif float(gamma) == float(int(gamma)) and int(gamma) >= 0:
        pow_1mp = one_m_p ** int(gamma)
        pow_p = p ** int(gamma)
    else:
        # Non-integer gamma fallback (EPS guards log(0); not exercised here).
        pow_1mp = jnp.exp(gamma * jnp.log(one_m_p + EPS))
        pow_p = jnp.exp(gamma * jnp.log(p + EPS))

    loss = -(y * pow_1mp * jnp.log(p + EPS)
             + (1.0 - y) * pow_p * jnp.log(one_m_p + EPS))     # [TN, C]

    # Mask rows past the true batch size (remainder tile reads are undefined).
    row = jax.lax.broadcasted_iota(jnp.int32, loss.shape, 0) + i * tn
    loss = jnp.where(row < n_valid, loss, 0.0)

    # Fold (TN, C) -> (8, C) with elementwise VPU adds; the class axis is kept
    # so the per-class weighting can be applied once in the epilogue.
    partial = loss.reshape(tn // _ACC_ROWS, _ACC_ROWS, loss.shape[1]).sum(axis=0)
    acc_ref[...] += partial

    @pl.when(i == pl.num_programs(0) - 1)
    def _finalize():
        w = w_ref[...].astype(jnp.float32)                     # [1, C]
        loss_ref[0, 0] = jnp.sum(acc_ref[...] * w) * jnp.float32(inv_count)


def _pick_block_rows(n_rows, c):
    """Largest multiple-of-8 row tile such that one f32 input block is <=2 MiB
    (2 inputs x 2 pipeline buffers -> <=8 MiB of VMEM), capped at 1024 rows and
    at the (rounded) batch size."""
    bytes_per_row = max(c, 1) * 4
    cap = max(_ACC_ROWS, (2 * 1024 * 1024) // bytes_per_row)
    tn = min(1024, cap, n_rows)
    return max(_ACC_ROWS, (tn // _ACC_ROWS) * _ACC_ROWS)


def focal_loss_multiclass(out, target, weights, gamma=2.0, block_rows=None):
    """out, target: [N, C]; weights: [C]. Returns scalar float32 loss."""
    out = jnp.asarray(out)
    target = jnp.asarray(target)
    n, c = out.shape
    w2d = jnp.asarray(weights, dtype=jnp.float32).reshape(1, c)

    # Tiny-batch guard: keep the row tile a multiple of 8 (sublane group) by
    # padding very small batches; padded rows are masked out in the kernel.
    if n < _ACC_ROWS:
        pad = _ACC_ROWS - n
        out = jnp.pad(out, ((0, pad), (0, 0)))
        target = jnp.pad(target, ((0, pad), (0, 0)))
    n_rows = out.shape[0]

    tn = block_rows if block_rows is not None else _pick_block_rows(n_rows, c)
    tn = min(int(tn), n_rows)
    tn = max(_ACC_ROWS, (tn // _ACC_ROWS) * _ACC_ROWS)
    grid_n = pl.cdiv(n_rows, tn)

    kernel = functools.partial(
        _focal_loss_kernel,
        gamma=float(gamma),
        n_valid=int(n),
        inv_count=1.0 / float(n * c),
    )

    res = pl.pallas_call(
        kernel,
        out_shape=jax.ShapeDtypeStruct((1, 1), jnp.float32),
        grid=(grid_n,),
        in_specs=[
            pl.BlockSpec((tn, c), lambda i: (i, 0)),       # logits tile
            pl.BlockSpec((tn, c), lambda i: (i, 0)),       # targets tile
            pl.BlockSpec((1, c), lambda i: (0, 0)),        # class weights
        ],
        out_specs=pl.BlockSpec((1, 1), lambda i: (0, 0),
                               memory_space=pltpu.MemorySpace.SMEM),
        scratch_shapes=[pltpu.VMEM((_ACC_ROWS, c), jnp.float32)],
        compiler_params=pltpu.CompilerParams(
            dimension_semantics=("arbitrary",),            # reduction axis
            vmem_limit_bytes=32 * 1024 * 1024,
        ),
    )(out, target, w2d)
    # TODO(synk): on v7x, a leading size-2 "parallel" grid axis with per-core
    # partial sums could split the reduction across both TensorCores.
    return res[0, 0]


def focal_loss_ref(out, target, weights, gamma=2.0):
    p = jax.nn.sigmoid(out.astype(jnp.float32))
    y = target.astype(jnp.float32)
    loss = -(y * (1.0 - p) ** gamma * jnp.log(p + EPS)
             + (1.0 - y) * p ** gamma * jnp.log(1.0 - p + EPS))
    return jnp.mean(loss * weights.reshape(1, -1).astype(jnp.float32))


if __name__ == "__main__":
    key = jax.random.PRNGKey(0)
    k_logits, k_labels = jax.random.split(key)

    N, C = 64, 16          # batch=64, num_classes=16
    GAMMA = 2.0

    logits = jax.random.normal(k_logits, (N, C), dtype=jnp.float32)
    labels = jax.random.randint(k_labels, (N,), 0, C)
    target = jax.nn.one_hot(labels, C, dtype=jnp.float32)
    weights = jnp.arange(1, C + 1, dtype=jnp.float32) / C

    # Exercise the grid (4 row tiles of 16).
    loss = focal_loss_multiclass(logits, target, weights, gamma=GAMMA,
                                 block_rows=16)
    jax.block_until_ready(loss)
    ref = focal_loss_ref(logits, target, weights, gamma=GAMMA)
    assert jnp.allclose(loss, ref, rtol=1e-5, atol=1e-6), (loss, ref)

    # Ragged batch: exercises the remainder-tile masking path.
    N2 = 52
    loss2 = focal_loss_multiclass(logits[:N2], target[:N2], weights,
                                  gamma=GAMMA, block_rows=16)
    jax.block_until_ready(loss2)
    ref2 = focal_loss_ref(logits[:N2], target[:N2], weights, gamma=GAMMA)
    assert jnp.allclose(loss2, ref2, rtol=1e-5, atol=1e-6), (loss2, ref2)

    print("KERNEL_OK")
</pallas_src>

<mosaic_0001>
module attributes {stable_mosaic.version = 11 : i64} {
  func.func @_focal_loss_kernel(%arg0: i32, %arg1: memref<16x16xf32, #tpu.memory_space<vmem>>, %arg2: memref<16x16xf32, #tpu.memory_space<vmem>>, %arg3: memref<1x16xf32, #tpu.memory_space<vmem>>, %arg4: memref<1x1xf32, #tpu.memory_space<smem>>, %arg5: memref<8x16xf32, #tpu.memory_space<vmem>>) attributes {dimension_semantics = [#tpu.dimension_semantics<arbitrary>], iteration_bounds = array<i64: 4>, scalar_prefetch = 0 : i64, scratch_operands = 1 : i64, tpu.core_type = #tpu.core_type<tc>, window_params = [{transform_indices = @transform_0, window_bounds = array<i64: 16, 16>}, {transform_indices = @transform_1, window_bounds = array<i64: 16, 16>}, {pipeline_mode = #tpu.pipeline_mode<synchronous>, transform_indices = @transform_2, window_bounds = array<i64: 1, 16>}, {transform_indices = @transform_3, window_bounds = array<i64: 1, 1>}]} {
    %c0_i32 = arith.constant 0 : i32
    %0 = arith.cmpi eq, %arg0, %c0_i32 : i32
    %1 = arith.extui %0 : i1 to i32
    %c0_i32_0 = arith.constant 0 : i32
    %2 = arith.cmpi ne, %1, %c0_i32_0 : i32
    scf.if %2 {
      %cst_16 = arith.constant 0.000000e+00 : f32
      %45 = vector.broadcast %cst_16 : f32 to vector<8x16xf32>
      %c0_17 = arith.constant 0 : index
      %c0_18 = arith.constant 0 : index
      %46 = vector.load %arg5[%c0_17, %c0_18] : memref<8x16xf32, #tpu.memory_space<vmem>>, vector<8x16xf32>
      tpu.vector_store %arg5[%c0_17, %c0_18], %45 {strides = array<i32>} : memref<8x16xf32, #tpu.memory_space<vmem>>, vector<8x16xf32>,
    } else {
    }
    %c0 = arith.constant 0 : index
    %c0_1 = arith.constant 0 : index
    %3 = vector.load %arg1[%c0, %c0_1] : memref<16x16xf32, #tpu.memory_space<vmem>>, vector<16x16xf32>
    %c0_2 = arith.constant 0 : index
    %c0_3 = arith.constant 0 : index
    %4 = vector.load %arg2[%c0_2, %c0_3] : memref<16x16xf32, #tpu.memory_space<vmem>>, vector<16x16xf32>
    %5 = arith.negf %3 : vector<16x16xf32>
    %6 = math.exp %5 : vector<16x16xf32>
    %cst = arith.constant 1.000000e+00 : f32
    %7 = vector.broadcast %cst : f32 to vector<16x16xf32>
    %8 = arith.addf %7, %6 : vector<16x16xf32>
    %9 = arith.divf %7, %8 : vector<16x16xf32>
    %cst_4 = arith.constant 1.000000e+00 : f32
    %10 = vector.broadcast %cst_4 : f32 to vector<16x16xf32>
    %11 = arith.subf %10, %9 : vector<16x16xf32>
    %12 = arith.mulf %11, %11 : vector<16x16xf32>
    %13 = arith.mulf %9, %9 : vector<16x16xf32>
    %14 = arith.mulf %4, %12 : vector<16x16xf32>
    %cst_5 = arith.constant 1.000000e-07 : f32
    %15 = vector.broadcast %cst_5 : f32 to vector<16x16xf32>
    %16 = arith.addf %9, %15 : vector<16x16xf32>
    %17 = math.log %16 : vector<16x16xf32>
    %18 = arith.mulf %14, %17 : vector<16x16xf32>
    %cst_6 = arith.constant 1.000000e+00 : f32
    %19 = vector.broadcast %cst_6 : f32 to vector<16x16xf32>
    %20 = arith.subf %19, %4 : vector<16x16xf32>
    %21 = arith.mulf %20, %13 : vector<16x16xf32>
    %cst_7 = arith.constant 1.000000e-07 : f32
    %22 = vector.broadcast %cst_7 : f32 to vector<16x16xf32>
    %23 = arith.addf %11, %22 : vector<16x16xf32>
    %24 = math.log %23 : vector<16x16xf32>
    %25 = arith.mulf %21, %24 : vector<16x16xf32>
    %26 = arith.addf %18, %25 : vector<16x16xf32>
    %cst_8 = arith.constant 0.000000e+00 : f32
    %27 = vector.broadcast %cst_8 : f32 to vector<16x16xf32>
    %28 = arith.subf %27, %26 : vector<16x16xf32>
    %29 = tpu.iota {dimensions = array<i32: 0>} : vector<16x16xi32>
    %c16_i32 = arith.constant 16 : i32
    %30 = arith.muli %arg0, %c16_i32 : i32
    %31 = vector.broadcast %30 : i32 to vector<16x16xi32>
    %32 = arith.addi %29, %31 : vector<16x16xi32>
    %c64_i32 = arith.constant 64 : i32
    %33 = vector.broadcast %c64_i32 : i32 to vector<16x16xi32>
    %34 = arith.cmpi slt, %32, %33 : vector<16x16xi32>
    %cst_9 = arith.constant 0.000000e+00 : f32
    %35 = vector.broadcast %cst_9 : f32 to vector<16x16xf32>
    %36 = arith.select %34, %28, %35 : vector<16x16xi1>, vector<16x16xf32>
    %37 = vector.shape_cast %36 : vector<16x16xf32> to vector<2x8x16xf32>
    %cst_10 = arith.constant dense<0.000000e+00> : vector<8x16xf32>
    %38 = vector.multi_reduction <add>, %37, %cst_10 [0] : vector<2x8x16xf32> to vector<8x16xf32>
    %c0_11 = arith.constant 0 : index
    %c0_12 = arith.constant 0 : index
    %39 = vector.load %arg5[%c0_11, %c0_12] : memref<8x16xf32, #tpu.memory_space<vmem>>, vector<8x16xf32>
    %40 = arith.addf %39, %38 : vector<8x16xf32>
    %c0_13 = arith.constant 0 : index
    %c0_14 = arith.constant 0 : index
    %41 = vector.load %arg5[%c0_13, %c0_14] : memref<8x16xf32, #tpu.memory_space<vmem>>, vector<8x16xf32>
    tpu.vector_store %arg5[%c0_13, %c0_14], %40 {strides = array<i32>} : memref<8x16xf32, #tpu.memory_space<vmem>>, vector<8x16xf32>,
    %c3_i32 = arith.constant 3 : i32
    %42 = arith.cmpi eq, %arg0, %c3_i32 : i32
    %43 = arith.extui %42 : i1 to i32
    %c0_i32_15 = arith.constant 0 : i32
    %44 = arith.cmpi ne, %43, %c0_i32_15 : i32
    scf.if %44 {
      %c0_16 = arith.constant 0 : index
      %c0_17 = arith.constant 0 : index
      %45 = vector.load %arg3[%c0_16, %c0_17] : memref<1x16xf32, #tpu.memory_space<vmem>>, vector<1x16xf32>
      %c0_18 = arith.constant 0 : index
      %c0_19 = arith.constant 0 : index
      %46 = vector.load %arg5[%c0_18, %c0_19] : memref<8x16xf32, #tpu.memory_space<vmem>>, vector<8x16xf32>
      %47 = vector.broadcast %45 : vector<1x16xf32> to vector<8x16xf32>
      %48 = arith.mulf %46, %47 : vector<8x16xf32>
      %49 = vector.shape_cast %48 : vector<8x16xf32> to vector<1x8x16xf32>
      %cst_20 = arith.constant dense<0.000000e+00> : vector<1xf32>
      %50 = vector.multi_reduction <add>, %49, %cst_20 [1, 2] : vector<1x8x16xf32> to vector<1xf32>
      %51 = vector.shape_cast %50 : vector<1xf32> to vector<1x1x1xf32>
      %52 = vector.extract %51[0, 0, 0] : f32 from vector<1x1x1xf32>
      %cst_21 = arith.constant 9.765625E-4 : f32
      %53 = arith.mulf %52, %cst_21 : f32
      %c0_22 = arith.constant 0 : index
      %c0_23 = arith.constant 0 : index
      %54 = memref.load %arg4[%c0_22, %c0_23] : memref<1x1xf32, #tpu.memory_space<smem>>
      memref.store %53, %arg4[%c0_22, %c0_23] : memref<1x1xf32, #tpu.memory_space<smem>>
    } else {
    }
    return
  }
  func.func @transform_0(%arg0: i32) -> (i32, i32) {
    %c0_i32 = arith.constant 0 : i32
    %c0_i32_0 = arith.constant 0 : i32
    return %arg0, %c0_i32 : i32, i32
  }
  func.func @transform_1(%arg0: i32) -> (i32, i32) {
    %c0_i32 = arith.constant 0 : i32
    %c0_i32_0 = arith.constant 0 : i32
    return %arg0, %c0_i32 : i32, i32
  }
  func.func @transform_2(%arg0: i32) -> (i32, i32) {
    %c0_i32 = arith.constant 0 : i32
    %c0_i32_0 = arith.constant 0 : i32
    %c0_i32_1 = arith.constant 0 : i32
    return %c0_i32, %c0_i32_0 : i32, i32
  }
  func.func @transform_3(%arg0: i32) -> (i32, i32) {
    %c0_i32 = arith.constant 0 : i32
    %c0_i32_0 = arith.constant 0 : i32
    %c0_i32_1 = arith.constant 0 : i32
    return %c0_i32, %c0_i32_0 : i32, i32
  }
}

</mosaic_0001>

<bundles_post_ra>
// kernel: tpu_custom_call.1
= control target key start
LH: loop header
LB: loop body
LE: loop exit
PB: predicated region body
PF: predicated region fallthrough
CT: control target
= control target key end

     0   :  { %8 = vsyncpa [#allocation4], 0  ;;  %s432_s12 = smov 0   ;;  %s466_s0 = inlined_call_operand.vmem [shape: f32[64,16], index: 0, kind: input, shape index: {}]   ;;  %s467_s1 = inlined_call_operand.vmem [shape: f32[64,16], index: 1, kind: input, shape index: {}]   ;;  %s468_s2 = inlined_call_operand.vmem [shape: f32[1,16], index: 2, kind: input, shape index: {}]   ;;  %s469_s3 = inlined_call_operand.hbm [shape: f32[1,1], index: 3, kind: output, shape index: {}]  }
   0x1 LB: > { %s438_s13 = sadd.s32 4294967295, %s408_s12   ;;  %p339_p0 = scmp.ge.s32.totalorder %s408_s12, 1  ;;  %s408_s12 = sphi %s432_s12, %s14_s12  }
   0x2   : > { %p145_p1 = scmp.lt.s32.totalorder %s408_s12, 5 }
   0x4   : > { %p146_p2 = pnand %p339_p0, %p145_p1 }
   0x5   : > { %s340_s14 = sshll.u32 (!%p146_p2), %s438_s13, 1  ;;  %p344_p4 = scmp.ne.s32.totalorder (!%p146_p2), %s438_s13, 0 }
   0x6   : > { %149 = sbr.rel (%p146_p2) target bundleno = 304 (0x130), region = 32  ;;  %p170_p3 = scmp.lt.s32.totalorder (!%p146_p2), %s340_s14, 7 }
   0xb   : > { %s471_s14 = smov (!%p170_p3, %s340_s14), 7  ;;  %184 = sbr.rel (%p344_p4) target bundleno = 18 (0x12), region = 36 }
   0xc   : > { %s341_s15 = sshll.u32 %s471_s14, 3 }
   0xd   : > { %s173_s18 = scalar_lea.vmem %s466_s0, %s341_s15  ;;  %s449_s21 = scalar_lea.vmem %s467_s1, %s341_s15 }
  0x10   : > { %vm185_vm0 = vcmask 130048   ;;  %v410_v0 = vmov 0.0  }
  0x11   : > { %186 = vst.msk [vmem:[#allocation2] sm:$0xff] %vm185_vm0, %v410_v0 }
  0x12 PF: > { %v187_v1 = vld [vmem:[%s173_s18] sm:$0xff]  ;;  %v188_v2 = vld [vmem:[%s173_s18 + $0x8] sm:$0xff]  ;;  %v235_v17 = vlaneseq  ;;  %s347_s22 = sshll.u32 %s438_s13, 4  ;;  %vm246_vm3 = vcmask 130048   ;;  %p348_p5 = scmp.ne.s32.totalorder %s438_s13, 3 }
  0x13   : > { %v345_v3 = vmul.f32 -1.442695, %v187_v1  ;;  %v346_v4 = vmul.f32 -1.442695, %v188_v2  ;;  %v189_v18 = vld [vmem:[%s449_s21] sm:$0xff]  ;;  %v190_v19 = vld [vmem:[%s449_s21 + $0x8] sm:$0xff]  ;;  %v239_v34 = vstv %s347_s22 }
  0x14   : > { %v219_v23 = vsub.f32 1.0, %v189_v18  ;;  %v236_v24 = vshrl.u32 %v235_v17, 7  ;;  %v220_v26 = vsub.f32 1.0, %v190_v19 }
  0x15   : > { %372 = vpow2.f32 %v345_v3 }
  0x16   : > { %374 = vpow2.f32 %v346_v4  ;;  %v237_v33 = vadd.s32 8, %v236_v24  ;;  %v240_v43 = vadd.s32 %v239_v34, %v236_v24 }
  0x18   : > { %v241_v45 = vadd.s32 %v239_v34, %v237_v33  ;;  %vm242_vm1 = vcmp.lt.s32.totalorder %v240_v43, 64  ;;  %v250_v55 = vld [vmem:[#allocation2] sm:$0xff] }
  0x1a   : > { %vm243_vm2 = vcmp.lt.s32.totalorder %v241_v45, 64 }
  0x22   : > { %v373_v5 = vpop.eup %372 }
  0x23   : > { %v375_v6 = vpop.eup %374  ;;  %v197_v7 = vadd.f32 1.0, %v373_v5 }
  0x24   : > { %v198_v8 = vadd.f32 1.0, %v375_v6 }
  0x25   : > { %376 = vrcp.f32 %v197_v7 }
  0x26   : > { %378 = vrcp.f32 %v198_v8 }
  0x32   : > { %v377_v9 = vpop.eup %376 }
  0x33   : > { %v379_v10 = vpop.eup %378  ;;  %v203_v11 = vsub.f32 1.0, %v377_v9  ;;  %v211_v12 = vadd.f32 1e-07, %v377_v9  ;;  %v207_v22 = vmul.f32 %v377_v9, %v377_v9 }
  0x34   : > { %v204_v13 = vsub.f32 1.0, %v379_v10  ;;  %v212_v14 = vadd.f32 1e-07, %v379_v10  ;;  %v208_v25 = vmul.f32 %v379_v10, %v379_v10 }
  0x35   : > { %380 = vlog2.f32 %v211_v12  ;;  %v223_v15 = vadd.f32 1e-07, %v203_v11  ;;  %v205_v20 = vmul.f32 %v203_v11, %v203_v11  ;;  %v221_v32 = vmul.f32 %v219_v23, %v207_v22 }
  0x36   : > { %382 = vlog2.f32 %v212_v14  ;;  %v224_v16 = vadd.f32 1e-07, %v204_v13  ;;  %v206_v21 = vmul.f32 %v204_v13, %v204_v13  ;;  %v222_v37 = vmul.f32 %v220_v26, %v208_v25 }
  0x37   : > { %384 = vlog2.f32 %v223_v15  ;;  %v209_v27 = vmul.f32 %v205_v20, %v189_v18 }
  0x38   : > { %386 = vlog2.f32 %v224_v16  ;;  %v210_v29 = vmul.f32 %v206_v21, %v190_v19 }
  0x42   : > { %v381_v28 = vpop.eup %380 }
  0x43   : > { %v383_v30 = vpop.eup %382  ;;  %v214_v31 = vmul.f32 0.6931472, %v381_v28 }
  0x44   : > { %v385_v35 = vpop.eup %384  ;;  %v216_v36 = vmul.f32 0.6931472, %v383_v30 }
  0x45   : > { %v387_v38 = vpop.eup %386  ;;  %v217_v39 = vmul.f32 %v214_v31, %v209_v27  ;;  %v226_v40 = vmul.f32 0.6931472, %v385_v35 }
  0x46   : > { %v218_v41 = vmul.f32 %v216_v36, %v210_v29  ;;  %v228_v42 = vmul.f32 0.6931472, %v387_v38 }
  0x47   : > { %v229_v44 = vmul.f32 %v226_v40, %v221_v32 }
  0x48   : > { %v230_v46 = vmul.f32 %v228_v42, %v222_v37 }
  0x49   : > { %v231_v47 = vadd.f32 %v229_v44, %v217_v39 }
  0x4a   : > { %v232_v48 = vadd.f32 %v230_v46, %v218_v41 }
  0x4b   : > { %v233_v49 = vsub.f32 0.0, %v231_v47 }
  0x4c   : > { %v234_v50 = vsub.f32 0.0, %v232_v48 }
  0x4d   : > { %v244_v51 = vsel %vm242_vm1, %v233_v49, 0.0 }
  0x4e   : > { %v245_v52 = vsel %vm243_vm2, %v234_v50, 0.0  ;;  %v247_v53 = vsel %vm246_vm3, %v244_v51, 0.0 }
  0x4f   : > { %v248_v54 = vsel %vm246_vm3, %v245_v52, 0.0 }
  0x50   : > { %v249_v56 = vadd.f32 %v248_v54, %v247_v53  ;;  %256 = sbr.rel (%p348_p5) target bundleno = 298 (0x12a), region = 40 }
  0x52   : > { %v251_v57 = vadd.f32 %v250_v55, %v249_v56 }
  0x54   : > { %252 = vst.msk [vmem:[#allocation2] sm:$0xff] %vm246_vm3, %v251_v57 }
  0x55   : > { %v349_v58 = vld [vmem:[%s468_s2] ss:$0 sm:$0xff] }
  0x5b   : > { %v258_v59 = vld [vmem:[#allocation2] sm:$0xff] }
  0x5c   : > { %v265_v60 = vmul.f32 %v349_v58, %v258_v59 }
  0x5e   : > { %v266_v61 = vsel %vm246_vm3, %v265_v60, 0.0 }
  0x5f   : > { %267 = vadd.xlane.f32.xlu0 %v266_v61 }
  0xe8   : > { %v268_v62 = vpop.xlane.xlu0 %267 }
  0xe9   : > { %v269_v63 = vrot.slane %v268_v62, 4 }
  0xeb   : > { %v270_v0 = vadd.f32 %v269_v63, %v268_v62 }
  0xed   : > { %v271_v1 = vrot.slane %v270_v0, 2 }
  0xef   : > { %v272_v2 = vadd.f32 %v271_v1, %v270_v0 }
  0xf1   : > { %v273_v3 = vrot.slane %v272_v2, 1 }
  0xf3   : > { %v274_v4 = vadd.f32 %v273_v3, %v272_v2 }
  0xf5   : > { %354 = vpush %v274_v4 }
 0x126   : > { %s355_s25 = spop %354 }
 0x127   : > { %s276_s26 = smul.f32 0.0009765625, %s355_s25 }
 0x129   : > { %278 = sst [smem:[#allocation3]] %s276_s26 }
 0x12a PF: > { %p360_p6 = scmp.eq.s32.totalorder %s438_s13, 3  ;;  %s411_s27 = smov [#allocation3]  }
 0x12c   : > { %357 = dma.smem_to_hbm (%p360_p6), %s411_s27, 16, %s469_s3, [#allocation4]  }
 0x12d   : > { %403 = dma.done.wait (%p360_p6), [#allocation4], 16  }
 0x12e   : > { %405 = vsyncadd (%p360_p6), [#allocation4], 4294967280 }
 0x12f   : > { %292 = sfence }
 0x130 PF: > { %s14_s12 = sadd.s32 1, %s408_s12  }
 0x131   : > { %p11_p7 = scmp.ge.s32.totalorder %s14_s12, 6  }
 0x133   :  { %13 = sbr.rel (!%p11_p7) target bundleno = 1 (0x1), region = 71 }
 0x138   :  { %298 = vsyncpa [#allocation4], 1 }
 0x139   :  { %300 = vsyncpa [#allocation4 + $0x1], 1 }

</bundles_post_ra>
